<compile_context>
chip_gen: v7x
topology: tpu7x:2x2x1
jax: 0.10.0
libtpu: 0.0.40
codegen_flags: <defaults>
</compile_context>

<pallas_src>
import functools

import jax
import jax.numpy as jnp
from jax.experimental import pallas as pl
from jax.experimental.pallas import tpu as pltpu


def _round_up(x, m):
    return ((x + m - 1) // m) * m


def _pick_tile(total, target):
    """Largest multiple of 128 that divides `total` and is <= target (>=128)."""
    best = 128
    t = 128
    while t <= min(total, target):
        if total % t == 0:
            best = t
        t += 128
    return min(best, total)


# ----------------------------- kernels --------------------------------------

def _fused_kernel(x_ref, w_ref, b_ref, o_ref):
    # Whole (padded) weight is VMEM-resident (index_map constant -> DMA'd once).
    # x tile is cast to the weight dtype in VMEM (no extra HBM pass in the
    # wrapper); MXU accumulates in f32; bias + ReLU epilogue in f32.
    acc = jnp.dot(x_ref[...].astype(w_ref.dtype), w_ref[...],
                  preferred_element_type=jnp.float32)
    o_ref[...] = jnp.maximum(acc + b_ref[...], 0.0).astype(o_ref.dtype)


def _acc_kernel(x_ref, w_ref, b_ref, o_ref, acc_ref):
    # Fallback for very wide layers: K-axis grid reduction with an f32 VMEM
    # accumulator; bias + ReLU + store only on the last K step.
    k = pl.program_id(2)

    @pl.when(k == 0)
    def _():
        acc_ref[...] = jnp.zeros_like(acc_ref)

    acc_ref[...] += jnp.dot(x_ref[...].astype(w_ref.dtype), w_ref[...],
                            preferred_element_type=jnp.float32)

    @pl.when(k == pl.num_programs(2) - 1)
    def _():
        o_ref[...] = jnp.maximum(acc_ref[...] + b_ref[...], 0.0).astype(o_ref.dtype)


# ----------------------------- wrapper ---------------------------------------

def prepare_params(weight, bias, compute_dtype=jnp.bfloat16):
    """Transpose + zero-pad Linear params ONCE (no per-call weight.T HBM copy).

    weight: [out_feats, in_feats] -> w_t [K_pad, F_pad] in compute_dtype
            (bf16 default: v6e/v7x MXU rate; accumulation stays f32 in-kernel)
    bias:   [out_feats]           -> b2d [1, F_pad] f32
    Zero padding keeps the valid output columns exact.
    """
    out_feats, in_feats = weight.shape
    k_pad = _round_up(in_feats, 128)
    f_pad = _round_up(out_feats, 128)
    w_t = jnp.zeros((k_pad, f_pad), compute_dtype)
    w_t = w_t.at[:in_feats, :out_feats].set(weight.T.astype(compute_dtype))
    b2d = jnp.zeros((1, f_pad), jnp.float32)
    b2d = b2d.at[0, :out_feats].set(bias.astype(jnp.float32))
    return w_t, b2d


_VMEM_WS_BUDGET = 28 << 20     # double-buffered working-set target (v7x-safe)
_VMEM_LIMIT_CAP = 48 << 20     # never request more than this (< v7x 64 MiB)


@functools.partial(
    jax.jit,
    static_argnames=("out_feats", "out_dtype", "tile_n", "tile_k", "tile_f"))
def node_apply(x, w_t, b2d, *, out_feats, out_dtype=None,
               tile_n=None, tile_k=None, tile_f=None):
    """h = relu(x @ W.T + b).  x: [N, in_feats] f32; (w_t, b2d) from prepare_params."""
    n, in_feats = x.shape
    k_pad, f_pad = w_t.shape
    assert in_feats <= k_pad and out_feats <= f_pad
    out_dtype = x.dtype if out_dtype is None else out_dtype

    x_it = jnp.dtype(x.dtype).itemsize
    w_it = jnp.dtype(w_t.dtype).itemsize
    o_it = jnp.dtype(out_dtype).itemsize

    # Zero-pad x along K only when in_feats isn't lane-aligned: the reduction
    # axis must never see OOB garbage.  N stays ragged (cdiv grid); Pallas
    # drops OOB row writes, so no row padding and no output slice are needed.
    x_in = x if in_feats == k_pad else jnp.pad(x, ((0, 0), (0, k_pad - in_feats)))

    # ---- row tile selection ----
    user_tile_n = tile_n is not None
    tile_n = 1024 if tile_n is None else tile_n
    tile_n = max(16, min(_round_up(tile_n, 16), _round_up(n, 16)))
    if not user_tile_n and n > 16 and pl.cdiv(n, tile_n) < 2:
        # >= 2 row tiles so both v7x TensorCores get work on the parallel axis.
        tile_n = max(16, _round_up(pl.cdiv(n, 2), 16))

    cost = pl.CostEstimate(
        flops=2 * n * k_pad * f_pad,
        transcendentals=0,
        bytes_accessed=int(n * k_pad * x_it + k_pad * f_pad * w_it
                           + f_pad * 4 + n * out_feats * o_it))

    # ---- fast path: whole weight resident, 1-D grid over row tiles ----
    def fused_ws(tn):
        return (2 * tn * k_pad * x_it        # x tiles (double-buffered)
                + 2 * k_pad * f_pad * w_it   # resident weight (2 buffers alloc'd)
                + 2 * tn * f_pad * o_it      # output tiles
                + 2 * f_pad * 4)             # bias

    if tile_k is None and tile_f is None:
        tn = tile_n
        while tn > 256 and fused_ws(tn) > _VMEM_WS_BUDGET:
            tn = _round_up(tn // 2, 16)
        if fused_ws(tn) <= _VMEM_WS_BUDGET:
            tile_n = tn
            vmem_limit = int(min(max(fused_ws(tile_n) + (4 << 20), 32 << 20),
                                 _VMEM_LIMIT_CAP))
            return pl.pallas_call(
                _fused_kernel,
                out_shape=jax.ShapeDtypeStruct((n, out_feats), out_dtype),
                grid_spec=pltpu.PrefetchScalarGridSpec(
                    num_scalar_prefetch=0,
                    grid=(pl.cdiv(n, tile_n),),
                    in_specs=[
                        pl.BlockSpec((tile_n, k_pad), lambda i: (i, 0)),
                        pl.BlockSpec((k_pad, f_pad), lambda i: (0, 0)),  # resident W
                        pl.BlockSpec((1, f_pad), lambda i: (0, 0)),
                    ],
                    out_specs=pl.BlockSpec((tile_n, f_pad), lambda i: (i, 0)),
                ),
                compiler_params=pltpu.CompilerParams(
                    dimension_semantics=("parallel",),
                    vmem_limit_bytes=vmem_limit),
                cost_estimate=cost,
            )(x_in, w_t, b2d)

    # ---- fallback: general K/F-tiled accumulator path ----
    if tile_k is None:
        tile_k = _pick_tile(k_pad, 2048)
    else:
        tile_k = min(_round_up(tile_k, 128), k_pad)
    if tile_f is None:
        tile_f = _pick_tile(f_pad, 512)
    else:
        tile_f = min(_round_up(tile_f, 128), f_pad)
    assert k_pad % tile_k == 0 and f_pad % tile_f == 0, "tiles must divide padded dims"

    def acc_ws(tn):
        return (2 * tn * tile_k * x_it + 2 * tile_k * tile_f * w_it
                + 2 * tn * tile_f * o_it + 2 * tile_f * 4
                + tn * tile_f * 4)           # f32 accumulator scratch

    while tile_n > 256 and acc_ws(tile_n) > _VMEM_WS_BUDGET:
        tile_n = _round_up(tile_n // 2, 16)
    vmem_limit = int(min(max(acc_ws(tile_n) + (4 << 20), 32 << 20),
                         _VMEM_LIMIT_CAP))

    return pl.pallas_call(
        _acc_kernel,
        out_shape=jax.ShapeDtypeStruct((n, out_feats), out_dtype),
        grid_spec=pltpu.PrefetchScalarGridSpec(
            num_scalar_prefetch=0,
            grid=(pl.cdiv(n, tile_n), f_pad // tile_f, k_pad // tile_k),
            in_specs=[
                pl.BlockSpec((tile_n, tile_k), lambda i, j, k: (i, k)),
                pl.BlockSpec((tile_k, tile_f), lambda i, j, k: (k, j)),
                pl.BlockSpec((1, tile_f), lambda i, j, k: (0, j)),
            ],
            out_specs=pl.BlockSpec((tile_n, tile_f), lambda i, j, k: (i, j)),
            scratch_shapes=[pltpu.VMEM((tile_n, tile_f), jnp.float32)],
        ),
        compiler_params=pltpu.CompilerParams(
            dimension_semantics=("parallel", "parallel", "arbitrary"),
            vmem_limit_bytes=vmem_limit),
        cost_estimate=cost,
    )(x_in, w_t, b2d)


def init_params(key, in_feats, out_feats):
    """Deterministic params matching nn.Linear + xavier_normal_ on the weight."""
    kw, kb = jax.random.split(key)
    std = (2.0 / (in_feats + out_feats)) ** 0.5          # xavier normal
    weight = std * jax.random.normal(kw, (out_feats, in_feats), jnp.float32)
    bound = 1.0 / (in_feats ** 0.5)                      # torch Linear bias init
    bias = jax.random.uniform(kb, (out_feats,), jnp.float32, -bound, bound)
    return weight, bias


if __name__ == "__main__":
    key = jax.random.PRNGKey(0)
    k_x1, k_p1, k_x2, k_p2, k_x3, k_p3 = jax.random.split(key, 6)

    # --- Test 1: ragged N/K/F, f32 weights -> exact nn.Linear + ReLU semantics.
    #     Exercises fused (weight-resident, 1-D grid) path with masked ragged
    #     row/col writes and no wrapper-side output slice.
    n1, in1, out1 = 200, 48, 24
    x1 = jax.random.normal(k_x1, (n1, in1), jnp.float32)
    w1, b1 = init_params(k_p1, in1, out1)
    wt1, bb1 = prepare_params(w1, b1, compute_dtype=jnp.float32)
    h1 = node_apply(x1, wt1, bb1, out_feats=out1)
    jax.block_until_ready(h1)
    ref1 = jnp.maximum(x1 @ w1.T + b1, 0.0)
    assert h1.shape == (n1, out1)
    assert jnp.allclose(h1, ref1, atol=1e-5, rtol=1e-5)

    # --- Test 2: lane-aligned shapes, default bf16 weights (f32 accumulate),
    #     bf16 output -> zero wrapper-side pad/cast/slice passes around the kernel.
    n2, in2, out2 = 256, 128, 256
    x2 = jax.random.normal(k_x2, (n2, in2), jnp.float32)
    w2, b2 = init_params(k_p2, in2, out2)
    wt2, bb2 = prepare_params(w2, b2)                      # bf16 by default
    h2 = node_apply(x2, wt2, bb2, out_feats=out2, out_dtype=jnp.bfloat16)
    jax.block_until_ready(h2)
    ref2 = jnp.maximum(x2 @ w2.T + b2, 0.0)
    assert h2.shape == (n2, out2)
    assert jnp.allclose(h2.astype(jnp.float32), ref2, atol=6e-2, rtol=6e-2)

    # --- Test 3: explicit K/F tiling -> exercises the grid-reduction
    #     accumulator fallback (f32 weights, K padded 300 -> 384, 3 K steps).
    n3, in3, out3 = 96, 300, 40
    x3 = jax.random.normal(k_x3, (n3, in3), jnp.float32)
    w3, b3 = init_params(k_p3, in3, out3)
    wt3, bb3 = prepare_params(w3, b3, compute_dtype=jnp.float32)
    h3 = node_apply(x3, wt3, bb3, out_feats=out3, tile_k=128, tile_f=128)
    jax.block_until_ready(h3)
    ref3 = jnp.maximum(x3 @ w3.T + b3, 0.0)
    assert h3.shape == (n3, out3)
    assert jnp.allclose(h3, ref3, atol=1e-3, rtol=1e-3)

    # TODO(synk): DGL's node.data['h'] dict plumbing is host-side graph
    # bookkeeping, not a device op; only Linear + activation is the kernel.
    print("KERNEL_OK")
</pallas_src>

<mosaic_0001>
module attributes {stable_mosaic.version = 11 : i64} {
  func.func @_fused_kernel(%arg0: i32, %arg1: memref<112x128xf32, #tpu.memory_space<vmem>>, %arg2: memref<128x128xf32, #tpu.memory_space<vmem>>, %arg3: memref<1x128xf32, #tpu.memory_space<vmem>>, %arg4: memref<112x128xf32, #tpu.memory_space<vmem>>) attributes {dimension_semantics = [#tpu.dimension_semantics<parallel>], iteration_bounds = array<i64: 2>, scalar_prefetch = 0 : i64, scratch_operands = 0 : i64, tpu.core_type = #tpu.core_type<tc>, window_params = [{transform_indices = @transform_0, window_bounds = array<i64: 112, 128>}, {pipeline_mode = #tpu.pipeline_mode<synchronous>, transform_indices = @transform_1, window_bounds = array<i64: 128, 128>}, {pipeline_mode = #tpu.pipeline_mode<synchronous>, transform_indices = @transform_2, window_bounds = array<i64: 1, 128>}, {transform_indices = @transform_3, window_bounds = array<i64: 112, 128>}]} {
    %c0 = arith.constant 0 : index
    %c0_0 = arith.constant 0 : index
    %0 = vector.load %arg1[%c0, %c0_0] : memref<112x128xf32, #tpu.memory_space<vmem>>, vector<112x128xf32>
    %c0_1 = arith.constant 0 : index
    %c0_2 = arith.constant 0 : index
    %1 = vector.load %arg2[%c0_1, %c0_2] : memref<128x128xf32, #tpu.memory_space<vmem>>, vector<128x128xf32>
    %cst = arith.constant dense<0.000000e+00> : vector<112x128xf32>
    %2 = tpu.matmul %0, %1, %cst {dimension_numbers = #tpu.dot_dimension_numbers<[1], [0], [0], [1], [0, 0, 1, 1], [], []>} : vector<112x128xf32>, vector<128x128xf32>, vector<112x128xf32> -> vector<112x128xf32>
    %c0_3 = arith.constant 0 : index
    %c0_4 = arith.constant 0 : index
    %3 = vector.load %arg3[%c0_3, %c0_4] : memref<1x128xf32, #tpu.memory_space<vmem>>, vector<1x128xf32>
    %4 = vector.broadcast %3 : vector<1x128xf32> to vector<112x128xf32>
    %5 = arith.addf %2, %4 : vector<112x128xf32>
    %cst_5 = arith.constant 0.000000e+00 : f32
    %6 = vector.broadcast %cst_5 : f32 to vector<112x128xf32>
    %7 = arith.maximumf %5, %6 : vector<112x128xf32>
    %c0_6 = arith.constant 0 : index
    %c0_7 = arith.constant 0 : index
    %8 = vector.load %arg4[%c0_6, %c0_7] : memref<112x128xf32, #tpu.memory_space<vmem>>, vector<112x128xf32>
    tpu.vector_store %arg4[%c0_6, %c0_7], %7 {strides = array<i32>} : memref<112x128xf32, #tpu.memory_space<vmem>>, vector<112x128xf32>,
    return
  }
  func.func @transform_0(%arg0: i32) -> (i32, i32) {
    %c0_i32 = arith.constant 0 : i32
    %c0_i32_0 = arith.constant 0 : i32
    return %arg0, %c0_i32 : i32, i32
  }
  func.func @transform_1(%arg0: i32) -> (i32, i32) {
    %c0_i32 = arith.constant 0 : i32
    %c0_i32_0 = arith.constant 0 : i32
    %c0_i32_1 = arith.constant 0 : i32
    return %c0_i32, %c0_i32_0 : i32, i32
  }
  func.func @transform_2(%arg0: i32) -> (i32, i32) {
    %c0_i32 = arith.constant 0 : i32
    %c0_i32_0 = arith.constant 0 : i32
    %c0_i32_1 = arith.constant 0 : i32
    return %c0_i32, %c0_i32_0 : i32, i32
  }
  func.func @transform_3(%arg0: i32) -> (i32, i32) {
    %c0_i32 = arith.constant 0 : i32
    %c0_i32_0 = arith.constant 0 : i32
    return %arg0, %c0_i32 : i32, i32
  }
}

</mosaic_0001>

<bundles_post_ra>
// kernel: node_apply.1
= control target key start
LH: loop header
LB: loop body
LE: loop exit
PB: predicated region body
PF: predicated region fallthrough
CT: control target
= control target key end

     0   :  { %s1013_s12 = smov 0   ;;  %s1015_s13 = smov 0   ;;  %s1225_s0 = inlined_call_operand.vmem [shape: f32[200,128], index: 0, kind: input, shape index: {}]   ;;  %s1226_s1 = inlined_call_operand.vmem [shape: f32[128,128], index: 1, kind: input, shape index: {}]   ;;  %s1227_s2 = inlined_call_operand.vmem [shape: f32[1,128], index: 2, kind: input, shape index: {}]   ;;  %s1228_s3 = inlined_call_operand.vmem [shape: f32[200,24], index: 3, kind: output, shape index: {}]  }
   0x1   :  { %s1017_s14 = smov 0  }
   0x2 LB: > { %s1026_s15 = sadd.s32 4294967295, %s959_s14   ;;  %s1028_s16 = sadd.s32 1, %s959_s14   ;;  %s959_s14 = sphi %s1017_s14, %s1235_s14   ;;  %s955_s13 = sphi %s1015_s13, %s1234_s13   ;;  %s951_s12 = sphi %s1013_s12, %s1233_s12  }
   0x3   : > { %s85_s17 = ssub.s32 %s959_s14, %s1028_s16  ;;  %s88_s18 = sadd.s32 1, %s955_s13 }
   0x4   : > { %p86_p0 = scmp.eq.s32.totalorder %s85_s17, 0  ;;  %p98_p1 = scmp.ne.s32.totalorder %s955_s13, %s951_s12 }
   0x5   : > { %p99_p2 = scmp.eq.s32.totalorder %s1026_s15, 1  ;;  %p664_p3 = scmp.ge.s32.totalorder %s959_s14, 1 }
   0x6   : > { %s1036_s19 = scalar_select %p86_p0, %s955_s13, %s88_s18  }
   0x7   : > { %p1038_p4 = por %p99_p2, %p98_p1  ;;  %p146_p5 = scmp.lt.s32.totalorder %s959_s14, 3 }
   0x9   : > { %p147_p6 = pnand %p664_p3, %p146_p5 }
   0xa   : > { %v206_v0 = vld [vmem:[%s1226_s1] sm:$0xff] (!%p147_p6)  ;;  %v207_v1 = vld [vmem:[%s1226_s1 + $0x8] sm:$0xff] (!%p147_p6)  ;;  %v208_v2 = vld [vmem:[%s1226_s1 + $0x10] sm:$0xff] (!%p147_p6)  ;;  %s1052_s27 = smul.u32 (!%p147_p6), 14, %s1026_s15 }
   0xb   : > { %150 = sbr.rel (%p147_p6) target bundleno = 336 (0x150), region = 32  ;;  %v763_v3 = vpack.c.bf16 (!%p147_p6), %v207_v1, %v206_v0  ;;  %v209_v4 = vld [vmem:[%s1226_s1 + $0x18] sm:$0xff] (!%p147_p6)  ;;  %v210_v6 = vld [vmem:[%s1226_s1 + $0x20] sm:$0xff] (!%p147_p6)  ;;  %v211_v7 = vld [vmem:[%s1226_s1 + $0x28] sm:$0xff] (!%p147_p6) }
   0xc   : > { %v767_v5 = vpack.c.bf16 (!%p147_p6), %v209_v4, %v208_v2  ;;  %p178_p7 = scmp.lt.s32.totalorder (!%p147_p6), %s1052_s27, 24  ;;  %v771_v8 = vpack.c.bf16 (!%p147_p6), %v211_v7, %v210_v6  ;;  %v212_v9 = vld [vmem:[%s1226_s1 + $0x30] sm:$0xff] (!%p147_p6)  ;;  %v213_v10 = vld [vmem:[%s1226_s1 + $0x38] sm:$0xff] (!%p147_p6)  ;;  %v214_v14 = vld [vmem:[%s1226_s1 + $0x40] sm:$0xff] (!%p147_p6) }
   0xd   : > { %764 = vmatprep.subr.bf16.mxu0 (!%p147_p6), %v763_v3  ;;  %795 = vmatprep.subr.bf16.mxu1 (!%p147_p6), %v763_v3  ;;  %v775_v13 = vpack.c.bf16 (!%p147_p6), %v213_v10, %v212_v9  ;;  %v215_v15 = vld [vmem:[%s1226_s1 + $0x48] sm:$0xff] (!%p147_p6)  ;;  %v216_v17 = vld [vmem:[%s1226_s1 + $0x50] sm:$0xff] (!%p147_p6)  ;;  %v217_v18 = vld [vmem:[%s1226_s1 + $0x58] sm:$0xff] (!%p147_p6) }
   0xe   : > { %766 = vmatpush3.bf16.msra.mxu0 (!%p147_p6), %v763_v3  ;;  %803 = vmatpush3.bf16.msra.mxu1 (!%p147_p6), %v763_v3  ;;  %v779_v16 = vpack.c.bf16 (!%p147_p6), %v215_v15, %v214_v14  ;;  %v783_v19 = vpack.c.bf16 (!%p147_p6), %v217_v18, %v216_v17  ;;  %v218_v20 = vld [vmem:[%s1226_s1 + $0x60] sm:$0xff] (!%p147_p6)  ;;  %v219_v21 = vld [vmem:[%s1226_s1 + $0x68] sm:$0xff] (!%p147_p6)  ;;  %v220_v23 = vld [vmem:[%s1226_s1 + $0x70] sm:$0xff] (!%p147_p6) }
   0xf   : > { %768 = vmatprep.subr.bf16.mxu0 (!%p147_p6), %v767_v5  ;;  %796 = vmatprep.subr.bf16.mxu1 (!%p147_p6), %v767_v5  ;;  %v787_v22 = vpack.c.bf16 (!%p147_p6), %v219_v21, %v218_v20  ;;  %v221_v24 = vld [vmem:[%s1226_s1 + $0x78] sm:$0xff] (!%p147_p6)  ;;  %v666_v38 = vld [vmem:[%s1227_s2] ss:$0 sm:$0xff] (!%p147_p6) }
  0x10   : > { %v791_v25 = vpack.c.bf16 (!%p147_p6), %v221_v24, %v220_v23 }
  0x12   : > { %s179_s7 = scalar_select %p178_p7, %s1052_s27, 24  ;;  %770 = vmatpush3.bf16.msra.mxu0 %v767_v5  ;;  %804 = vmatpush3.bf16.msra.mxu1 %v767_v5 }
  0x13   : > { %772 = vmatprep.subr.bf16.mxu0 %v771_v8  ;;  %797 = vmatprep.subr.bf16.mxu1 %v771_v8  ;;  %s679_s23 = smul.u32 (%p1038_p4), 112, %s1026_s15 }
  0x14   : > { %s665_s14 = sshll.u32 %s179_s7, 3 }
  0x15   : > { %s1074_s21 = scalar_lea.vmem %s1225_s0, %s665_s14  ;;  %s170_s14 = sand.u32 1, %s951_s12  }
  0x16   : > { %v192_v11 = vld [vmem:[%s1074_s21] sm:$0xff]  ;;  %774 = vmatpush3.bf16.msra.mxu0 %v771_v8  ;;  %805 = vmatpush3.bf16.msra.mxu1 %v771_v8  ;;  %v193_v26 = vld [vmem:[%s1074_s21 + $0x8] sm:$0xff]  ;;  %v194_v28 = vld [vmem:[%s1074_s21 + $0x10] sm:$0xff]  ;;  %s811_s17 = smul.u32 112, %s170_s14  ;;  %s1141_s26 = scalar_lea.vmem (%p1038_p4), %s1228_s3, %s679_s23  }
  0x17   : > { %v200_v12 = vld [vmem:[%s1074_s21 + $0x40] sm:$0xff]  ;;  %742 = vmatprep.mubr.f32.mxu0 %v192_v11  ;;  %776 = vmatprep.subr.bf16.mxu0 %v775_v13  ;;  %v201_v27 = vld [vmem:[%s1074_s21 + $0x48] sm:$0xff]  ;;  %v202_v29 = vld [vmem:[%s1074_s21 + $0x50] sm:$0xff] }
  0x18   : > { %754 = vmatprep.mubr.f32.mxu1 %v200_v12  ;;  %798 = vmatprep.subr.bf16.mxu1 %v775_v13  ;;  %v195_v30 = vld [vmem:[%s1074_s21 + $0x18] sm:$0xff]  ;;  %v196_v32 = vld [vmem:[%s1074_s21 + $0x20] sm:$0xff]  ;;  %v197_v34 = vld [vmem:[%s1074_s21 + $0x28] sm:$0xff]  ;;  %s1118_s12 = scalar_lea.vmem [#allocation2], %s811_s17  }
  0x19   : > { %v203_v31 = vld [vmem:[%s1074_s21 + $0x58] sm:$0xff]  ;;  %v204_v33 = vld [vmem:[%s1074_s21 + $0x60] sm:$0xff]  ;;  %v205_v35 = vld [vmem:[%s1074_s21 + $0x68] sm:$0xff] }
  0x1a   : > { %778 = vmatpush3.bf16.msra.mxu0 %v775_v13  ;;  %806 = vmatpush3.bf16.msra.mxu1 %v775_v13  ;;  %v198_v36 = vld [vmem:[%s1074_s21 + $0x30] sm:$0xff]  ;;  %v199_v37 = vld [vmem:[%s1074_s21 + $0x38] sm:$0xff]  ;;  %s400_s21 = ssub.s32 (%p1038_p4), 25, %s1052_s27 }
  0x1b   : > { %780 = vmatprep.subr.bf16.mxu0 %v779_v16  ;;  %799 = vmatprep.subr.bf16.mxu1 %v779_v16  ;;  %p401_p8 = scmp.lt.s32.totalorder (%p1038_p4), %s400_s21, 14 }
  0x1e   : > { %782 = vmatpush3.bf16.msra.mxu0 %v779_v16  ;;  %807 = vmatpush3.bf16.msra.mxu1 %v779_v16 }
  0x1f   : > { %784 = vmatprep.subr.bf16.mxu0 %v783_v19  ;;  %800 = vmatprep.subr.bf16.mxu1 %v783_v19 }
  0x22   : > { %786 = vmatpush3.bf16.msra.mxu0 %v783_v19  ;;  %808 = vmatpush3.bf16.msra.mxu1 %v783_v19 }
  0x23   : > { %788 = vmatprep.subr.bf16.mxu0 %v787_v22  ;;  %801 = vmatprep.subr.bf16.mxu1 %v787_v22 }
  0x26   : > { %790 = vmatpush3.bf16.msra.mxu0 %v787_v22  ;;  %809 = vmatpush3.bf16.msra.mxu1 %v787_v22 }
  0x27   : > { %792 = vmatprep.subr.bf16.mxu0 %v791_v25  ;;  %802 = vmatprep.subr.bf16.mxu1 %v791_v25 }
  0x2a   : > { %794 = vmatpush3.bf16.msra.mxu0 %v791_v25  ;;  %810 = vmatpush3.bf16.msra.mxu1 %v791_v25 }
  0x2d   : > { %743 = vmatmul.mubr.f32.vlgmr.msra.gmra.mrb[0].mxu0 %v193_v26  ;;  %755 = vmatmul.mubr.f32.vlgmr.msra.gmra.mrb[0].mxu1 %v201_v27 }
  0x2e   : > { %745 = vmatprep.mubr.f32.mxu0 %v194_v28  ;;  %757 = vmatprep.mubr.f32.mxu1 %v202_v29 }
  0x31   : > { %746 = vmatmul.mubr.f32.gmra.mrb[2].mxu0 %v195_v30  ;;  %758 = vmatmul.mubr.f32.gmra.mrb[2].mxu1 %v203_v31 }
  0x32   : > { %748 = vmatprep.mubr.f32.mxu0 %v196_v32  ;;  %760 = vmatprep.mubr.f32.mxu1 %v204_v33 }
  0x35   : > { %749 = vmatmul.mubr.f32.gmra.mrb[4].mxu0 %v197_v34  ;;  %761 = vmatmul.mubr.f32.gmra.mrb[4].mxu1 %v205_v35 }
  0x36   : > { %751 = vmatprep.mubr.f32.mxu0 %v198_v36 }
  0x39   : > { %752 = vmatmul.mubr.f32.gmra.mrb[6].mxu0 %v199_v37 }
 0x100   : > { %v744_v39 = vpop.f32.mrb[0].mxu0  ;;  %v756_v40 = vpop.f32.mrb[0].mxu1 }
 0x101   : > { %v301_v41 = vadd.f32 %v744_v39, %v666_v38  ;;  %v295_v42 = vpop.f32.mrb[1].mxu0  ;;  %v341_v43 = vadd.f32 %v756_v40, %v666_v38  ;;  %v335_v44 = vpop.f32.mrb[1].mxu1 }
 0x102   : > { %v296_v45 = vadd.f32 %v666_v38, %v295_v42  ;;  %v336_v46 = vadd.f32 %v666_v38, %v335_v44 }
 0x103   : > { %v365_v47 = vmax.f32 %v301_v41, 0.0  ;;  %v373_v48 = vmax.f32 %v341_v43, 0.0 }
 0x104   : > { %v364_v49 = vmax.f32 %v296_v45, 0.0  ;;  %v747_v50 = vpop.f32.mrb[2].mxu0  ;;  %v372_v51 = vmax.f32 %v336_v46, 0.0  ;;  %v759_v52 = vpop.f32.mrb[2].mxu1 }
 0x105   : > { %379 = vst [vmem:[%s1118_s12 + $0x8] sm:$0xff] %v365_v47  ;;  %387 = vst [vmem:[%s1118_s12 + $0x48] sm:$0xff] %v373_v48  ;;  %v311_v53 = vadd.f32 %v747_v50, %v666_v38  ;;  %v305_v54 = vpop.f32.mrb[3].mxu0  ;;  %v351_v55 = vadd.f32 %v759_v52, %v666_v38  ;;  %v345_v56 = vpop.f32.mrb[3].mxu1 }
 0x106   : > { %378 = vst [vmem:[%s1118_s12] sm:$0xff] %v364_v49  ;;  %386 = vst [vmem:[%s1118_s12 + $0x40] sm:$0xff] %v372_v51  ;;  %v306_v57 = vadd.f32 %v666_v38, %v305_v54  ;;  %v346_v58 = vadd.f32 %v666_v38, %v345_v56 }
 0x107   : > { %v367_v59 = vmax.f32 %v311_v53, 0.0  ;;  %v375_v60 = vmax.f32 %v351_v55, 0.0 }
 0x108   : > { %v366_v61 = vmax.f32 %v306_v57, 0.0  ;;  %v750_v62 = vpop.f32.mrb[4].mxu0  ;;  %v374_v63 = vmax.f32 %v346_v58, 0.0  ;;  %v762_v0 = vpop.f32.mrb[4].mxu1 }
 0x109   : > { %381 = vst [vmem:[%s1118_s12 + $0x18] sm:$0xff] %v367_v59  ;;  %389 = vst [vmem:[%s1118_s12 + $0x58] sm:$0xff] %v375_v60  ;;  %v321_v1 = vadd.f32 %v750_v62, %v666_v38  ;;  %v315_v2 = vpop.f32.mrb[5].mxu0  ;;  %v361_v3 = vadd.f32 %v762_v0, %v666_v38  ;;  %v355_v4 = vpop.f32.mrb[5].mxu1 }
 0x10a   : > { %380 = vst [vmem:[%s1118_s12 + $0x10] sm:$0xff] %v366_v61  ;;  %388 = vst [vmem:[%s1118_s12 + $0x50] sm:$0xff] %v374_v63  ;;  %v316_v5 = vadd.f32 %v666_v38, %v315_v2  ;;  %v356_v6 = vadd.f32 %v666_v38, %v355_v4 }
 0x10b   : > { %v369_v7 = vmax.f32 %v321_v1, 0.0  ;;  %v377_v8 = vmax.f32 %v361_v3, 0.0 }
 0x10c   : > { %v368_v9 = vmax.f32 %v316_v5, 0.0  ;;  %v753_v10 = vpop.f32.mrb[6].mxu0  ;;  %v376_v11 = vmax.f32 %v356_v6, 0.0  ;;  %398 = sbr.rel (!%p1038_p4) target bundleno = 336 (0x150), region = 36 }
 0x10d   : > { %383 = vst [vmem:[%s1118_s12 + $0x28] sm:$0xff] %v369_v7  ;;  %391 = vst [vmem:[%s1118_s12 + $0x68] sm:$0xff] %v377_v8  ;;  %v331_v12 = vadd.f32 %v753_v10, %v666_v38  ;;  %v325_v13 = vpop.f32.mrb[7].mxu0 }
 0x10e   : > { %382 = vst [vmem:[%s1118_s12 + $0x20] sm:$0xff] %v368_v9  ;;  %390 = vst [vmem:[%s1118_s12 + $0x60] sm:$0xff] %v376_v11  ;;  %v326_v14 = vadd.f32 %v666_v38, %v325_v13 }
 0x10f   : > { %v371_v15 = vmax.f32 %v331_v12, 0.0 }
 0x110   : > { %v370_v16 = vmax.f32 %v326_v14, 0.0 }
 0x111   : > { %385 = vst [vmem:[%s1118_s12 + $0x38] sm:$0xff] %v371_v15 }
 0x112   : > { %384 = vst [vmem:[%s1118_s12 + $0x30] sm:$0xff] %v370_v16 }
 0x113   : > { %s1237_s21 = smov (!%p401_p8, %s400_s21), 14 }
 0x114   : > { %s667_s28 = sshll.u32 %s1237_s21, 7 }
 0x115   : > { %p670_p9 = scmp.eq.s32.totalorder %s667_s28, 0 }
 0x116   : > { %901 = sdivrem.u32 (!%p670_p9), %s1237_s21, 14 }
 0x117   : > { %409 = sbr.rel (%p670_p9) target bundleno = 336 (0x150), region = 40 }
 0x11f   : > { %s1147_s20 = spop.drf %901 }
 0x120   : > { %p671_p10 = scmp.le.s32.totalorder %s1147_s20, 0 }
 0x121   : > { %s1230_s15 = smov (!%p671_p10), %s1141_s26  ;;  %s1231_s27 = smov (!%p671_p10), %s1118_s12 }
 0x122   : > { %617 = sbr.rel (%p671_p10) target bundleno = 307 (0x133), region = 116  ;;  %s1156_s29 = smov (!%p671_p10), 0  }
 0x123   : > { %s1158_s30 = smov (!%p671_p10), 0  }
 0x129 LB: >> { %v499_v17 = vld [vmem:[%s967_s27] sm:$0xff]  ;;  %v501_v18 = vld [vmem:[%s967_s27 + $0x8] sm:$0xff]  ;;  %v503_v19 = vld [vmem:[%s967_s27 + $0x10] sm:$0xff]  ;;  %s527_s4 = sadd.s32 1, %s971_s29  ;;  %s493_s30 = sadd.s32 1, %s975_s30   ;;  %s975_s30 = sphi %s1158_s30, %s493_s30   ;;  %s971_s29 = sphi %s1156_s29, %s1232_s29   ;;  %s967_s27 = sphi %s1231_s27, %s532_s27   ;;  %s963_s15 = sphi %s1230_s15, %s533_s15  }
 0x12a   : >> { %500 = vst [vmem:[%s963_s15] sm:$0xff] %v499_v17  ;;  %502 = vst [vmem:[%s963_s15 + $0x8] sm:$0xff] %v501_v18  ;;  %v505_v20 = vld [vmem:[%s967_s27 + $0x18] sm:$0xff]  ;;  %v507_v21 = vld [vmem:[%s967_s27 + $0x20] sm:$0xff]  ;;  %p528_p11 = scmp.ge.s32.totalorder %s527_s4, %s1147_s20  ;;  %p492_p12 = scmp.ge.s32.totalorder %s493_s30, %s1147_s20 }
 0x12b   : >> { %504 = vst [vmem:[%s963_s15 + $0x10] sm:$0xff] %v503_v19  ;;  %v509_v22 = vld [vmem:[%s967_s27 + $0x28] sm:$0xff]  ;;  %506 = vst [vmem:[%s963_s15 + $0x18] sm:$0xff] %v505_v20  ;;  %v511_v23 = vld [vmem:[%s967_s27 + $0x30] sm:$0xff] }
 0x12c   : >> { %508 = vst [vmem:[%s963_s15 + $0x20] sm:$0xff] %v507_v21  ;;  %510 = vst [vmem:[%s963_s15 + $0x28] sm:$0xff] %v509_v22  ;;  %v513_v24 = vld [vmem:[%s967_s27 + $0x38] sm:$0xff]  ;;  %v515_v25 = vld [vmem:[%s967_s27 + $0x40] sm:$0xff]  ;;  %s1239_s4 = smov (%p528_p11, %s527_s4), 0  ;;  %495 = sbr.rel (!%p492_p12) target bundleno = 297 (0x129), region = 122 }
 0x12d   : >> { %512 = vst [vmem:[%s963_s15 + $0x30] sm:$0xff] %v511_v23  ;;  %514 = vst [vmem:[%s963_s15 + $0x38] sm:$0xff] %v513_v24  ;;  %v517_v26 = vld [vmem:[%s967_s27 + $0x48] sm:$0xff]  ;;  %v519_v27 = vld [vmem:[%s967_s27 + $0x50] sm:$0xff]  ;;  %s530_s5 = smul.u32 112, %s1239_s4  ;;  %s1232_s29 = smov %s1239_s4 }
 0x12e   : >> { %516 = vst [vmem:[%s963_s15 + $0x40] sm:$0xff] %v515_v25  ;;  %v521_v28 = vld [vmem:[%s967_s27 + $0x58] sm:$0xff]  ;;  %518 = vst [vmem:[%s963_s15 + $0x48] sm:$0xff] %v517_v26  ;;  %v523_v29 = vld [vmem:[%s967_s27 + $0x60] sm:$0xff] }
 0x12f   : >> { %520 = vst [vmem:[%s963_s15 + $0x50] sm:$0xff] %v519_v27  ;;  %522 = vst [vmem:[%s963_s15 + $0x58] sm:$0xff] %v521_v28  ;;  %v525_v30 = vld [vmem:[%s967_s27 + $0x68] sm:$0xff]  ;;  %s532_s27 = scalar_lea.vmem %s1118_s12, %s530_s5 [#allocation2]  }
 0x130   : >> { %524 = vst [vmem:[%s963_s15 + $0x60] sm:$0xff] %v523_v29  ;;  %526 = vst [vmem:[%s963_s15 + $0x68] sm:$0xff] %v525_v30  ;;  %s533_s15 = scalar_lea.vmem %s1141_s26, %s530_s5  }
 0x133 PF: > { %903 = sdivrem.u32 %s1237_s21, 14 }
 0x134   : > { %s672_s6 = smul.u32 112, %s1147_s20 }
 0x136   : > { %s538_s7 = scalar_lea.vmem %s1118_s12, %s672_s6 [#allocation2]   ;;  %s540_s8 = scalar_lea.vmem %s1141_s26, %s672_s6  }
 0x13c   : > { %s904_s9 = spop.drf %903 }
 0x13d   : > { %p674_p13 = scmp.le.s32.totalorder %s904_s9, 0 }
 0x13e   : > { %s977_s10 = smov (!%p674_p13), %s540_s8   ;;  %s981_s11 = smov (!%p674_p13), %s538_s7  }
 0x13f   : > { %631 = sbr.rel (%p674_p13) target bundleno = 336 (0x150), region = 127  ;;  %s985_s14 = smov (!%p674_p13), 0  }
 0x140   : > { %s989_s17 = smov (!%p674_p13), 0  }
 0x146 LB: >> { %v550_v31 = vld [vmem:[%s983_s11] sm:$0xff]  ;;  %s552_s18 = sadd.s32 1, %s987_s14  ;;  %s544_s17 = sadd.s32 1, %s991_s17   ;;  %s991_s17 = sphi %s989_s17, %s544_s17   ;;  %s987_s14 = sphi %s985_s14, %s986_s14   ;;  %s983_s11 = sphi %s981_s11, %s557_s11   ;;  %s979_s10 = sphi %s977_s10, %s558_s10  }
 0x147   : >> { %551 = vst [vmem:[%s979_s10] sm:$0xff] %v550_v31  ;;  %p553_p0 = scmp.ge.s32.totalorder %s552_s18, %s904_s9  ;;  %p543_p1 = scmp.ge.s32.totalorder %s544_s17, %s904_s9 }
 0x149   : >> { %s1241_s18 = smov (%p553_p0, %s552_s18), 0  ;;  %546 = sbr.rel (!%p543_p1) target bundleno = 326 (0x146), region = 133 }
 0x14a   : >> { %s675_s22 = sshll.u32 %s1241_s18, 3  ;;  %s986_s14 = smov %s1241_s18  }
 0x14b   : >> { %s557_s11 = scalar_lea.vmem %s538_s7, %s675_s22 [#allocation2]   ;;  %s558_s10 = scalar_lea.vmem %s540_s8, %s675_s22  }
 0x150 PF: > { %p10_p2 = scmp.ge.s32.totalorder %s1028_s16, 4   ;;  %s1233_s12 = smov %s955_s13 }
 0x151   : > { %s1234_s13 = smov %s1036_s19  ;;  %s1235_s14 = smov %s1028_s16 }
 0x152   :  { %12 = sbr.rel (!%p10_p2) target bundleno = 2 (0x2), region = 144 }

</bundles_post_ra>
